<compile_context>
chip_gen: v5e
topology: v5e:2x2
jax: 0.10.0
libtpu: 0.0.40
codegen_flags: <defaults>
</compile_context>

<pallas_src>
import jax
import jax.numpy as jnp
import numpy as np
from jax.experimental import pallas as pl
from jax.experimental.pallas import tpu as pltpu

# ----- model hyper-parameters (small, consistent with RNNEncoder defaults) -----
STATE_DIM, ACTION_DIM, REWARD_SIZE = 2, 2, 1
STATE_EMBED, ACTION_EMBED, REWARD_EMBED = 10, 10, 5
HIDDEN = 32
LATENT = 16
NUM_GRU_LAYERS = 1                                   # args.num_gru_layers
T, B = 8, 4                                          # sequence length, batch size
D_RAW = ACTION_DIM + STATE_DIM + REWARD_SIZE         # raw concat dim (= 5)
D_IN = ACTION_EMBED + STATE_EMBED + REWARD_EMBED     # GRU input dim (= 25)
SLAB = 128                                           # lane-dense packed output width
assert HIDDEN + 3 * LATENT <= SLAB


# --------------------------------- kernel --------------------------------------
def rnn_encoder_kernel(
    x_ref,        # (T*B, D_RAW)  raw concat [actions | states | rewards]
    h0_ref,       # (B, H)        initial hidden state (layer 0)
    eps_ref,      # (T*B, L)      reparameterisation noise
    wfeat_ref,    # (D_RAW, D_IN) block-diagonal [Wa | Ws | Wr]
    bfeat_ref,    # (1, D_IN)     [ba | bs | br]
    wih_ref,      # (D_IN, 3H)    GRU W_ih.T, torch gate order [r | z | n]
    whh_ref,      # (H, 3H)       GRU W_hh.T
    whead_ref,    # (H, 2L)       [Wmu | Wlv]
    bhead_ref,    # (1, 2L)       [bmu | blv]
    out_ref,      # (T*B, SLAB)   packed: [gru_h | mu | logvar | sample | 0-pad]
    gi_scr,       # (T*B, 3H)     VMEM scratch: batched input-gate projection
    gru_scr,      # (T*B, H)      VMEM scratch: per-step GRU outputs
):
    H, L, TB = HIDDEN, LATENT, T * B

    def dot(a, b):
        return jnp.dot(a, b, preferred_element_type=jnp.float32)

    # ---- batched, non-recurrent prologue (all T*B rows at once) ----
    feat = jax.nn.relu(dot(x_ref[...], wfeat_ref[...]) + bfeat_ref[...])
    gi_scr[...] = dot(feat, wih_ref[...])

    whh = whh_ref[...]
    h = h0_ref[...]

    # ---- sequential GRU recurrence, fully unrolled (T is static & small) ----
    # GRU biases are nn.init.constant_(0) in __init__, so they are omitted exactly.
    for t in range(T):
        gi = gi_scr[t * B:(t + 1) * B, :]
        gh = dot(h, whh)
        r = jax.nn.sigmoid(gi[:, 0:H] + gh[:, 0:H])
        z = jax.nn.sigmoid(gi[:, H:2 * H] + gh[:, H:2 * H])
        n = jnp.tanh(gi[:, 2 * H:3 * H] + r * gh[:, 2 * H:3 * H])
        h = (1.0 - z) * n + z * h
        gru_scr[t * B:(t + 1) * B, :] = h

    # ---- batched epilogue: heads + reparameterisation for all T*B rows ----
    gru_all = gru_scr[...]
    heads = dot(gru_all, whead_ref[...]) + bhead_ref[...]
    mu = heads[:, 0:L]
    lv = heads[:, L:2 * L]
    smp = eps_ref[...] * jnp.exp(0.5 * lv) + mu
    pad = jnp.zeros((TB, SLAB - (H + 3 * L)), jnp.float32)
    # single lane-dense (T*B, 128) store
    out_ref[...] = jnp.concatenate([gru_all, mu, lv, smp, pad], axis=-1)


# ------------------------------- wrapper ----------------------------------------
def rnn_encoder_forward(actions, states, rewards, hidden_state, eps, params):
    """Returns (latent_sample, latent_mean, latent_logvar, hidden_state)."""
    Tl, Bl = actions.shape[0], actions.shape[1]
    H, L = HIDDEN, LATENT
    TB = Tl * Bl

    # --- host-side (plain JAX) weight fusion; no runtime compute in the kernel ---
    # block-diagonal feature weight: relu commutes with the lane-blocked concat.
    Wfeat = jnp.zeros((D_RAW, D_IN), jnp.float32)
    Wfeat = Wfeat.at[0:ACTION_DIM, 0:ACTION_EMBED].set(params["Wa"])
    Wfeat = Wfeat.at[ACTION_DIM:ACTION_DIM + STATE_DIM,
                     ACTION_EMBED:ACTION_EMBED + STATE_EMBED].set(params["Ws"])
    Wfeat = Wfeat.at[ACTION_DIM + STATE_DIM:,
                     ACTION_EMBED + STATE_EMBED:].set(params["Wr"])
    bfeat = jnp.concatenate([params["ba"], params["bs"], params["br"]], axis=-1)

    Wih_T = params["Wih"].T                                     # (D_IN, 3H)
    Whh_T = params["Whh"].T                                     # (H, 3H)
    Whead = jnp.concatenate([params["Wmu"], params["Wlv"]], axis=-1)   # (H, 2L)
    bhead = jnp.concatenate([params["bmu"], params["blv"]], axis=-1)   # (1, 2L)

    x_raw = jnp.concatenate([actions, states, rewards], axis=-1).reshape(TB, D_RAW)
    eps2d = eps.reshape(TB, L)
    h0 = hidden_state[0]                                        # (B, H), single layer

    slab = pl.pallas_call(
        rnn_encoder_kernel,
        out_shape=jax.ShapeDtypeStruct((TB, SLAB), jnp.float32),
        in_specs=[pl.BlockSpec(memory_space=pltpu.MemorySpace.VMEM)] * 9,
        out_specs=pl.BlockSpec(memory_space=pltpu.MemorySpace.VMEM),
        scratch_shapes=[
            pltpu.VMEM((TB, 3 * H), jnp.float32),   # gi_scr
            pltpu.VMEM((TB, H), jnp.float32),       # gru_scr
        ],
    )(x_raw, h0, eps2d, Wfeat, bfeat, Wih_T, Whh_T, Whead, bhead)

    gru_out = slab[:, 0:H].reshape(Tl, Bl, H)
    latent_mean = slab[:, H:H + L].reshape(Tl, Bl, L)
    latent_logvar = slab[:, H + L:H + 2 * L].reshape(Tl, Bl, L)
    latent_sample = slab[:, H + 2 * L:H + 3 * L].reshape(Tl, Bl, L)
    h_final = gru_out[Tl - 1][None]                 # (num_layers=1, B, H)
    # (latent_mean.shape[0] == 1 squeeze branch not hit here since T > 1)
    return latent_sample, latent_mean, latent_logvar, h_final


# --------------------------- params & reference ---------------------------------
def init_params(key):
    ks = list(jax.random.split(key, 8))

    def linear(k, fan_in, fan_out):
        k1, k2 = jax.random.split(k)
        bound = 1.0 / np.sqrt(fan_in)
        W = jax.random.uniform(k1, (fan_in, fan_out), jnp.float32, -bound, bound)
        b = jax.random.uniform(k2, (1, fan_out), jnp.float32, -bound, bound)
        return W, b

    def orthogonal(k, rows, cols):
        a = jax.random.normal(k, (max(rows, cols), min(rows, cols)), jnp.float32)
        q, _ = jnp.linalg.qr(a)
        return q if rows >= cols else q.T

    Wa, ba = linear(ks[0], ACTION_DIM, ACTION_EMBED)
    Ws, bs = linear(ks[1], STATE_DIM, STATE_EMBED)
    Wr, br = linear(ks[2], REWARD_SIZE, REWARD_EMBED)
    Wih = orthogonal(ks[3], 3 * HIDDEN, D_IN)        # torch layout (3H, D_IN), order [r,z,n]
    Whh = orthogonal(ks[4], 3 * HIDDEN, HIDDEN)
    Wmu, bmu = linear(ks[5], HIDDEN, LATENT)
    Wlv, blv = linear(ks[6], HIDDEN, LATENT)
    return dict(Wa=Wa, ba=ba, Ws=Ws, bs=bs, Wr=Wr, br=br,
                Wih=Wih, Whh=Whh, Wmu=Wmu, bmu=bmu, Wlv=Wlv, blv=blv)


def reference(actions, states, rewards, h0, eps, p):
    ha = jax.nn.relu(actions @ p["Wa"] + p["ba"])
    hs = jax.nn.relu(states @ p["Ws"] + p["bs"])
    hr = jax.nn.relu(rewards @ p["Wr"] + p["br"])
    x = jnp.concatenate([ha, hs, hr], axis=-1)
    Wih_T, Whh_T = p["Wih"].T, p["Whh"].T
    H = HIDDEN

    def cell(h, xt):
        gi = xt @ Wih_T
        gh = h @ Whh_T
        r = jax.nn.sigmoid(gi[:, :H] + gh[:, :H])
        z = jax.nn.sigmoid(gi[:, H:2 * H] + gh[:, H:2 * H])
        n = jnp.tanh(gi[:, 2 * H:] + r * gh[:, 2 * H:])
        hn = (1.0 - z) * n + z * h
        return hn, hn

    hT, outs = jax.lax.scan(cell, h0[0], x)
    mu = outs @ p["Wmu"] + p["bmu"]
    lv = outs @ p["Wlv"] + p["blv"]
    smp = eps * jnp.exp(0.5 * lv) + mu
    return smp, mu, lv, hT[None]


# ------------------------------------ main ---------------------------------------
if __name__ == "__main__":
    key = jax.random.PRNGKey(0)
    kp, ka, ks_, kr, kh, ke = jax.random.split(key, 6)
    params = init_params(kp)

    actions = jax.random.normal(ka, (T, B, ACTION_DIM), jnp.float32)
    states = jax.random.normal(ks_, (T, B, STATE_DIM), jnp.float32)
    rewards = jax.random.normal(kr, (T, B, REWARD_SIZE), jnp.float32)
    hidden_state = 0.1 * jax.random.normal(kh, (NUM_GRU_LAYERS, B, HIDDEN), jnp.float32)
    eps = jax.random.normal(ke, (T, B, LATENT), jnp.float32)   # randn_like in reparameterise

    smp, mu, lv, hT = rnn_encoder_forward(actions, states, rewards, hidden_state, eps, params)
    jax.block_until_ready((smp, mu, lv, hT))

    rsmp, rmu, rlv, rhT = reference(actions, states, rewards, hidden_state, eps, params)
    for got, want in ((smp, rsmp), (mu, rmu), (lv, rlv), (hT, rhT)):
        np.testing.assert_allclose(np.asarray(got), np.asarray(want), rtol=1e-2, atol=1e-2)

    print("KERNEL_OK")
</pallas_src>

<mosaic_0001>
module attributes {stable_mosaic.version = 11 : i64} {
  func.func @rnn_encoder_kernel(%arg0: memref<32x5xf32, #tpu.memory_space<vmem>>, %arg1: memref<4x32xf32, #tpu.memory_space<vmem>>, %arg2: memref<32x16xf32, #tpu.memory_space<vmem>>, %arg3: memref<5x25xf32, #tpu.memory_space<vmem>>, %arg4: memref<1x25xf32, #tpu.memory_space<vmem>>, %arg5: memref<25x96xf32, #tpu.memory_space<vmem>>, %arg6: memref<32x96xf32, #tpu.memory_space<vmem>>, %arg7: memref<32x32xf32, #tpu.memory_space<vmem>>, %arg8: memref<1x32xf32, #tpu.memory_space<vmem>>, %arg9: memref<32x128xf32, #tpu.memory_space<vmem>>, %arg10: memref<32x96xf32, #tpu.memory_space<vmem>>, %arg11: memref<32x32xf32, #tpu.memory_space<vmem>>) attributes {dimension_semantics = [], scalar_prefetch = 0 : i64, scratch_operands = 2 : i64, tpu.core_type = #tpu.core_type<tc>} {
    %c0 = arith.constant 0 : index
    %c0_0 = arith.constant 0 : index
    %0 = vector.load %arg0[%c0, %c0_0] : memref<32x5xf32, #tpu.memory_space<vmem>>, vector<32x5xf32>
    %c0_1 = arith.constant 0 : index
    %c0_2 = arith.constant 0 : index
    %1 = vector.load %arg3[%c0_1, %c0_2] : memref<5x25xf32, #tpu.memory_space<vmem>>, vector<5x25xf32>
    %cst = arith.constant dense<0.000000e+00> : vector<32x25xf32>
    %2 = tpu.matmul %0, %1, %cst {dimension_numbers = #tpu.dot_dimension_numbers<[1], [0], [0], [1], [0, 0, 1, 1], [], []>} : vector<32x5xf32>, vector<5x25xf32>, vector<32x25xf32> -> vector<32x25xf32>
    %c0_3 = arith.constant 0 : index
    %c0_4 = arith.constant 0 : index
    %3 = vector.load %arg4[%c0_3, %c0_4] : memref<1x25xf32, #tpu.memory_space<vmem>>, vector<1x25xf32>
    %4 = vector.broadcast %3 : vector<1x25xf32> to vector<32x25xf32>
    %5 = arith.addf %2, %4 : vector<32x25xf32>
    %cst_5 = arith.constant 0.000000e+00 : f32
    %6 = vector.broadcast %cst_5 : f32 to vector<32x25xf32>
    %7 = arith.maximumf %5, %6 : vector<32x25xf32>
    %c0_6 = arith.constant 0 : index
    %c0_7 = arith.constant 0 : index
    %8 = vector.load %arg5[%c0_6, %c0_7] : memref<25x96xf32, #tpu.memory_space<vmem>>, vector<25x96xf32>
    %cst_8 = arith.constant dense<0.000000e+00> : vector<32x96xf32>
    %9 = tpu.matmul %7, %8, %cst_8 {dimension_numbers = #tpu.dot_dimension_numbers<[1], [0], [0], [1], [0, 0, 1, 1], [], []>} : vector<32x25xf32>, vector<25x96xf32>, vector<32x96xf32> -> vector<32x96xf32>
    %c0_9 = arith.constant 0 : index
    %c0_10 = arith.constant 0 : index
    %10 = vector.load %arg10[%c0_9, %c0_10] : memref<32x96xf32, #tpu.memory_space<vmem>>, vector<32x96xf32>
    tpu.vector_store %arg10[%c0_9, %c0_10], %9 {strides = array<i32>} : memref<32x96xf32, #tpu.memory_space<vmem>>, vector<32x96xf32>,
    %c0_11 = arith.constant 0 : index
    %c0_12 = arith.constant 0 : index
    %11 = vector.load %arg6[%c0_11, %c0_12] : memref<32x96xf32, #tpu.memory_space<vmem>>, vector<32x96xf32>
    %c0_13 = arith.constant 0 : index
    %c0_14 = arith.constant 0 : index
    %12 = vector.load %arg1[%c0_13, %c0_14] : memref<4x32xf32, #tpu.memory_space<vmem>>, vector<4x32xf32>
    %c0_15 = arith.constant 0 : index
    %c0_16 = arith.constant 0 : index
    %13 = vector.load %arg10[%c0_15, %c0_16] : memref<32x96xf32, #tpu.memory_space<vmem>>, vector<4x96xf32>
    %cst_17 = arith.constant dense<0.000000e+00> : vector<4x96xf32>
    %14 = tpu.matmul %12, %11, %cst_17 {dimension_numbers = #tpu.dot_dimension_numbers<[1], [0], [0], [1], [0, 0, 1, 1], [], []>} : vector<4x32xf32>, vector<32x96xf32>, vector<4x96xf32> -> vector<4x96xf32>
    %15 = vector.extract_strided_slice %13 {offsets = [0, 0], sizes = [4, 32], strides = [1, 1]} : vector<4x96xf32> to vector<4x32xf32>
    %16 = vector.extract_strided_slice %14 {offsets = [0, 0], sizes = [4, 32], strides = [1, 1]} : vector<4x96xf32> to vector<4x32xf32>
    %17 = arith.addf %15, %16 : vector<4x32xf32>
    %18 = arith.negf %17 : vector<4x32xf32>
    %19 = math.exp %18 : vector<4x32xf32>
    %cst_18 = arith.constant 1.000000e+00 : f32
    %20 = vector.broadcast %cst_18 : f32 to vector<4x32xf32>
    %21 = arith.addf %20, %19 : vector<4x32xf32>
    %22 = arith.divf %20, %21 : vector<4x32xf32>
    %23 = vector.extract_strided_slice %13 {offsets = [0, 32], sizes = [4, 32], strides = [1, 1]} : vector<4x96xf32> to vector<4x32xf32>
    %24 = vector.extract_strided_slice %14 {offsets = [0, 32], sizes = [4, 32], strides = [1, 1]} : vector<4x96xf32> to vector<4x32xf32>
    %25 = arith.addf %23, %24 : vector<4x32xf32>
    %26 = arith.negf %25 : vector<4x32xf32>
    %27 = math.exp %26 : vector<4x32xf32>
    %cst_19 = arith.constant 1.000000e+00 : f32
    %28 = vector.broadcast %cst_19 : f32 to vector<4x32xf32>
    %29 = arith.addf %28, %27 : vector<4x32xf32>
    %30 = arith.divf %28, %29 : vector<4x32xf32>
    %31 = vector.extract_strided_slice %13 {offsets = [0, 64], sizes = [4, 32], strides = [1, 1]} : vector<4x96xf32> to vector<4x32xf32>
    %32 = vector.extract_strided_slice %14 {offsets = [0, 64], sizes = [4, 32], strides = [1, 1]} : vector<4x96xf32> to vector<4x32xf32>
    %33 = arith.mulf %22, %32 : vector<4x32xf32>
    %34 = arith.addf %31, %33 : vector<4x32xf32>
    %35 = math.tanh %34 : vector<4x32xf32>
    %cst_20 = arith.constant 1.000000e+00 : f32
    %36 = vector.broadcast %cst_20 : f32 to vector<4x32xf32>
    %37 = arith.subf %36, %30 : vector<4x32xf32>
    %38 = arith.mulf %37, %35 : vector<4x32xf32>
    %39 = arith.mulf %30, %12 : vector<4x32xf32>
    %40 = arith.addf %38, %39 : vector<4x32xf32>
    %c0_21 = arith.constant 0 : index
    %c0_22 = arith.constant 0 : index
    %41 = vector.load %arg11[%c0_21, %c0_22] : memref<32x32xf32, #tpu.memory_space<vmem>>, vector<4x32xf32>
    tpu.vector_store %arg11[%c0_21, %c0_22], %40 {strides = array<i32>} : memref<32x32xf32, #tpu.memory_space<vmem>>, vector<4x32xf32>,
    %c4 = arith.constant 4 : index
    %c0_23 = arith.constant 0 : index
    %42 = vector.load %arg10[%c4, %c0_23] : memref<32x96xf32, #tpu.memory_space<vmem>>, vector<4x96xf32>
    %cst_24 = arith.constant dense<0.000000e+00> : vector<4x96xf32>
    %43 = tpu.matmul %40, %11, %cst_24 {dimension_numbers = #tpu.dot_dimension_numbers<[1], [0], [0], [1], [0, 0, 1, 1], [], []>} : vector<4x32xf32>, vector<32x96xf32>, vector<4x96xf32> -> vector<4x96xf32>
    %44 = vector.extract_strided_slice %42 {offsets = [0, 0], sizes = [4, 32], strides = [1, 1]} : vector<4x96xf32> to vector<4x32xf32>
    %45 = vector.extract_strided_slice %43 {offsets = [0, 0], sizes = [4, 32], strides = [1, 1]} : vector<4x96xf32> to vector<4x32xf32>
    %46 = arith.addf %44, %45 : vector<4x32xf32>
    %47 = arith.negf %46 : vector<4x32xf32>
    %48 = math.exp %47 : vector<4x32xf32>
    %cst_25 = arith.constant 1.000000e+00 : f32
    %49 = vector.broadcast %cst_25 : f32 to vector<4x32xf32>
    %50 = arith.addf %49, %48 : vector<4x32xf32>
    %51 = arith.divf %49, %50 : vector<4x32xf32>
    %52 = vector.extract_strided_slice %42 {offsets = [0, 32], sizes = [4, 32], strides = [1, 1]} : vector<4x96xf32> to vector<4x32xf32>
    %53 = vector.extract_strided_slice %43 {offsets = [0, 32], sizes = [4, 32], strides = [1, 1]} : vector<4x96xf32> to vector<4x32xf32>
    %54 = arith.addf %52, %53 : vector<4x32xf32>
    %55 = arith.negf %54 : vector<4x32xf32>
    %56 = math.exp %55 : vector<4x32xf32>
    %cst_26 = arith.constant 1.000000e+00 : f32
    %57 = vector.broadcast %cst_26 : f32 to vector<4x32xf32>
    %58 = arith.addf %57, %56 : vector<4x32xf32>
    %59 = arith.divf %57, %58 : vector<4x32xf32>
    %60 = vector.extract_strided_slice %42 {offsets = [0, 64], sizes = [4, 32], strides = [1, 1]} : vector<4x96xf32> to vector<4x32xf32>
    %61 = vector.extract_strided_slice %43 {offsets = [0, 64], sizes = [4, 32], strides = [1, 1]} : vector<4x96xf32> to vector<4x32xf32>
    %62 = arith.mulf %51, %61 : vector<4x32xf32>
    %63 = arith.addf %60, %62 : vector<4x32xf32>
    %64 = math.tanh %63 : vector<4x32xf32>
    %cst_27 = arith.constant 1.000000e+00 : f32
    %65 = vector.broadcast %cst_27 : f32 to vector<4x32xf32>
    %66 = arith.subf %65, %59 : vector<4x32xf32>
    %67 = arith.mulf %66, %64 : vector<4x32xf32>
    %68 = arith.mulf %59, %40 : vector<4x32xf32>
    %69 = arith.addf %67, %68 : vector<4x32xf32>
    %c4_28 = arith.constant 4 : index
    %c0_29 = arith.constant 0 : index
    %70 = vector.load %arg11[%c4_28, %c0_29] : memref<32x32xf32, #tpu.memory_space<vmem>>, vector<4x32xf32>
    tpu.vector_store %arg11[%c4_28, %c0_29], %69 {strides = array<i32>} : memref<32x32xf32, #tpu.memory_space<vmem>>, vector<4x32xf32>,
    %c8 = arith.constant 8 : index
    %c0_30 = arith.constant 0 : index
    %71 = vector.load %arg10[%c8, %c0_30] : memref<32x96xf32, #tpu.memory_space<vmem>>, vector<4x96xf32>
    %cst_31 = arith.constant dense<0.000000e+00> : vector<4x96xf32>
    %72 = tpu.matmul %69, %11, %cst_31 {dimension_numbers = #tpu.dot_dimension_numbers<[1], [0], [0], [1], [0, 0, 1, 1], [], []>} : vector<4x32xf32>, vector<32x96xf32>, vector<4x96xf32> -> vector<4x96xf32>
    %73 = vector.extract_strided_slice %71 {offsets = [0, 0], sizes = [4, 32], strides = [1, 1]} : vector<4x96xf32> to vector<4x32xf32>
    %74 = vector.extract_strided_slice %72 {offsets = [0, 0], sizes = [4, 32], strides = [1, 1]} : vector<4x96xf32> to vector<4x32xf32>
    %75 = arith.addf %73, %74 : vector<4x32xf32>
    %76 = arith.negf %75 : vector<4x32xf32>
    %77 = math.exp %76 : vector<4x32xf32>
    %cst_32 = arith.constant 1.000000e+00 : f32
    %78 = vector.broadcast %cst_32 : f32 to vector<4x32xf32>
    %79 = arith.addf %78, %77 : vector<4x32xf32>
    %80 = arith.divf %78, %79 : vector<4x32xf32>
    %81 = vector.extract_strided_slice %71 {offsets = [0, 32], sizes = [4, 32], strides = [1, 1]} : vector<4x96xf32> to vector<4x32xf32>
    %82 = vector.extract_strided_slice %72 {offsets = [0, 32], sizes = [4, 32], strides = [1, 1]} : vector<4x96xf32> to vector<4x32xf32>
    %83 = arith.addf %81, %82 : vector<4x32xf32>
    %84 = arith.negf %83 : vector<4x32xf32>
    %85 = math.exp %84 : vector<4x32xf32>
    %cst_33 = arith.constant 1.000000e+00 : f32
    %86 = vector.broadcast %cst_33 : f32 to vector<4x32xf32>
    %87 = arith.addf %86, %85 : vector<4x32xf32>
    %88 = arith.divf %86, %87 : vector<4x32xf32>
    %89 = vector.extract_strided_slice %71 {offsets = [0, 64], sizes = [4, 32], strides = [1, 1]} : vector<4x96xf32> to vector<4x32xf32>
    %90 = vector.extract_strided_slice %72 {offsets = [0, 64], sizes = [4, 32], strides = [1, 1]} : vector<4x96xf32> to vector<4x32xf32>
    %91 = arith.mulf %80, %90 : vector<4x32xf32>
    %92 = arith.addf %89, %91 : vector<4x32xf32>
    %93 = math.tanh %92 : vector<4x32xf32>
    %cst_34 = arith.constant 1.000000e+00 : f32
    %94 = vector.broadcast %cst_34 : f32 to vector<4x32xf32>
    %95 = arith.subf %94, %88 : vector<4x32xf32>
    %96 = arith.mulf %95, %93 : vector<4x32xf32>
    %97 = arith.mulf %88, %69 : vector<4x32xf32>
    %98 = arith.addf %96, %97 : vector<4x32xf32>
    %c8_35 = arith.constant 8 : index
    %c0_36 = arith.constant 0 : index
    %99 = vector.load %arg11[%c8_35, %c0_36] : memref<32x32xf32, #tpu.memory_space<vmem>>, vector<4x32xf32>
    tpu.vector_store %arg11[%c8_35, %c0_36], %98 {strides = array<i32>} : memref<32x32xf32, #tpu.memory_space<vmem>>, vector<4x32xf32>,
    %c12 = arith.constant 12 : index
    %c0_37 = arith.constant 0 : index
    %100 = vector.load %arg10[%c12, %c0_37] : memref<32x96xf32, #tpu.memory_space<vmem>>, vector<4x96xf32>
    %cst_38 = arith.constant dense<0.000000e+00> : vector<4x96xf32>
    %101 = tpu.matmul %98, %11, %cst_38 {dimension_numbers = #tpu.dot_dimension_numbers<[1], [0], [0], [1], [0, 0, 1, 1], [], []>} : vector<4x32xf32>, vector<32x96xf32>, vector<4x96xf32> -> vector<4x96xf32>
    %102 = vector.extract_strided_slice %100 {offsets = [0, 0], sizes = [4, 32], strides = [1, 1]} : vector<4x96xf32> to vector<4x32xf32>
    %103 = vector.extract_strided_slice %101 {offsets = [0, 0], sizes = [4, 32], strides = [1, 1]} : vector<4x96xf32> to vector<4x32xf32>
    %104 = arith.addf %102, %103 : vector<4x32xf32>
    %105 = arith.negf %104 : vector<4x32xf32>
    %106 = math.exp %105 : vector<4x32xf32>
    %cst_39 = arith.constant 1.000000e+00 : f32
    %107 = vector.broadcast %cst_39 : f32 to vector<4x32xf32>
    %108 = arith.addf %107, %106 : vector<4x32xf32>
    %109 = arith.divf %107, %108 : vector<4x32xf32>
    %110 = vector.extract_strided_slice %100 {offsets = [0, 32], sizes = [4, 32], strides = [1, 1]} : vector<4x96xf32> to vector<4x32xf32>
    %111 = vector.extract_strided_slice %101 {offsets = [0, 32], sizes = [4, 32], strides = [1, 1]} : vector<4x96xf32> to vector<4x32xf32>
    %112 = arith.addf %110, %111 : vector<4x32xf32>
    %113 = arith.negf %112 : vector<4x32xf32>
    %114 = math.exp %113 : vector<4x32xf32>
    %cst_40 = arith.constant 1.000000e+00 : f32
    %115 = vector.broadcast %cst_40 : f32 to vector<4x32xf32>
    %116 = arith.addf %115, %114 : vector<4x32xf32>
    %117 = arith.divf %115, %116 : vector<4x32xf32>
    %118 = vector.extract_strided_slice %100 {offsets = [0, 64], sizes = [4, 32], strides = [1, 1]} : vector<4x96xf32> to vector<4x32xf32>
    %119 = vector.extract_strided_slice %101 {offsets = [0, 64], sizes = [4, 32], strides = [1, 1]} : vector<4x96xf32> to vector<4x32xf32>
    %120 = arith.mulf %109, %119 : vector<4x32xf32>
    %121 = arith.addf %118, %120 : vector<4x32xf32>
    %122 = math.tanh %121 : vector<4x32xf32>
    %cst_41 = arith.constant 1.000000e+00 : f32
    %123 = vector.broadcast %cst_41 : f32 to vector<4x32xf32>
    %124 = arith.subf %123, %117 : vector<4x32xf32>
    %125 = arith.mulf %124, %122 : vector<4x32xf32>
    %126 = arith.mulf %117, %98 : vector<4x32xf32>
    %127 = arith.addf %125, %126 : vector<4x32xf32>
    %c12_42 = arith.constant 12 : index
    %c0_43 = arith.constant 0 : index
    %128 = vector.load %arg11[%c12_42, %c0_43] : memref<32x32xf32, #tpu.memory_space<vmem>>, vector<4x32xf32>
    tpu.vector_store %arg11[%c12_42, %c0_43], %127 {strides = array<i32>} : memref<32x32xf32, #tpu.memory_space<vmem>>, vector<4x32xf32>,
    %c16 = arith.constant 16 : index
    %c0_44 = arith.constant 0 : index
    %129 = vector.load %arg10[%c16, %c0_44] : memref<32x96xf32, #tpu.memory_space<vmem>>, vector<4x96xf32>
    %cst_45 = arith.constant dense<0.000000e+00> : vector<4x96xf32>
    %130 = tpu.matmul %127, %11, %cst_45 {dimension_numbers = #tpu.dot_dimension_numbers<[1], [0], [0], [1], [0, 0, 1, 1], [], []>} : vector<4x32xf32>, vector<32x96xf32>, vector<4x96xf32> -> vector<4x96xf32>
    %131 = vector.extract_strided_slice %129 {offsets = [0, 0], sizes = [4, 32], strides = [1, 1]} : vector<4x96xf32> to vector<4x32xf32>
    %132 = vector.extract_strided_slice %130 {offsets = [0, 0], sizes = [4, 32], strides = [1, 1]} : vector<4x96xf32> to vector<4x32xf32>
    %133 = arith.addf %131, %132 : vector<4x32xf32>
    %134 = arith.negf %133 : vector<4x32xf32>
    %135 = math.exp %134 : vector<4x32xf32>
    %cst_46 = arith.constant 1.000000e+00 : f32
    %136 = vector.broadcast %cst_46 : f32 to vector<4x32xf32>
    %137 = arith.addf %136, %135 : vector<4x32xf32>
    %138 = arith.divf %136, %137 : vector<4x32xf32>
    %139 = vector.extract_strided_slice %129 {offsets = [0, 32], sizes = [4, 32], strides = [1, 1]} : vector<4x96xf32> to vector<4x32xf32>
    %140 = vector.extract_strided_slice %130 {offsets = [0, 32], sizes = [4, 32], strides = [1, 1]} : vector<4x96xf32> to vector<4x32xf32>
    %141 = arith.addf %139, %140 : vector<4x32xf32>
    %142 = arith.negf %141 : vector<4x32xf32>
    %143 = math.exp %142 : vector<4x32xf32>
    %cst_47 = arith.constant 1.000000e+00 : f32
    %144 = vector.broadcast %cst_47 : f32 to vector<4x32xf32>
    %145 = arith.addf %144, %143 : vector<4x32xf32>
    %146 = arith.divf %144, %145 : vector<4x32xf32>
    %147 = vector.extract_strided_slice %129 {offsets = [0, 64], sizes = [4, 32], strides = [1, 1]} : vector<4x96xf32> to vector<4x32xf32>
    %148 = vector.extract_strided_slice %130 {offsets = [0, 64], sizes = [4, 32], strides = [1, 1]} : vector<4x96xf32> to vector<4x32xf32>
    %149 = arith.mulf %138, %148 : vector<4x32xf32>
    %150 = arith.addf %147, %149 : vector<4x32xf32>
    %151 = math.tanh %150 : vector<4x32xf32>
    %cst_48 = arith.constant 1.000000e+00 : f32
    %152 = vector.broadcast %cst_48 : f32 to vector<4x32xf32>
    %153 = arith.subf %152, %146 : vector<4x32xf32>
    %154 = arith.mulf %153, %151 : vector<4x32xf32>
    %155 = arith.mulf %146, %127 : vector<4x32xf32>
    %156 = arith.addf %154, %155 : vector<4x32xf32>
    %c16_49 = arith.constant 16 : index
    %c0_50 = arith.constant 0 : index
    %157 = vector.load %arg11[%c16_49, %c0_50] : memref<32x32xf32, #tpu.memory_space<vmem>>, vector<4x32xf32>
    tpu.vector_store %arg11[%c16_49, %c0_50], %156 {strides = array<i32>} : memref<32x32xf32, #tpu.memory_space<vmem>>, vector<4x32xf32>,
    %c20 = arith.constant 20 : index
    %c0_51 = arith.constant 0 : index
    %158 = vector.load %arg10[%c20, %c0_51] : memref<32x96xf32, #tpu.memory_space<vmem>>, vector<4x96xf32>
    %cst_52 = arith.constant dense<0.000000e+00> : vector<4x96xf32>
    %159 = tpu.matmul %156, %11, %cst_52 {dimension_numbers = #tpu.dot_dimension_numbers<[1], [0], [0], [1], [0, 0, 1, 1], [], []>} : vector<4x32xf32>, vector<32x96xf32>, vector<4x96xf32> -> vector<4x96xf32>
    %160 = vector.extract_strided_slice %158 {offsets = [0, 0], sizes = [4, 32], strides = [1, 1]} : vector<4x96xf32> to vector<4x32xf32>
    %161 = vector.extract_strided_slice %159 {offsets = [0, 0], sizes = [4, 32], strides = [1, 1]} : vector<4x96xf32> to vector<4x32xf32>
    %162 = arith.addf %160, %161 : vector<4x32xf32>
    %163 = arith.negf %162 : vector<4x32xf32>
    %164 = math.exp %163 : vector<4x32xf32>
    %cst_53 = arith.constant 1.000000e+00 : f32
    %165 = vector.broadcast %cst_53 : f32 to vector<4x32xf32>
    %166 = arith.addf %165, %164 : vector<4x32xf32>
    %167 = arith.divf %165, %166 : vector<4x32xf32>
    %168 = vector.extract_strided_slice %158 {offsets = [0, 32], sizes = [4, 32], strides = [1, 1]} : vector<4x96xf32> to vector<4x32xf32>
    %169 = vector.extract_strided_slice %159 {offsets = [0, 32], sizes = [4, 32], strides = [1, 1]} : vector<4x96xf32> to vector<4x32xf32>
    %170 = arith.addf %168, %169 : vector<4x32xf32>
    %171 = arith.negf %170 : vector<4x32xf32>
    %172 = math.exp %171 : vector<4x32xf32>
    %cst_54 = arith.constant 1.000000e+00 : f32
    %173 = vector.broadcast %cst_54 : f32 to vector<4x32xf32>
    %174 = arith.addf %173, %172 : vector<4x32xf32>
    %175 = arith.divf %173, %174 : vector<4x32xf32>
    %176 = vector.extract_strided_slice %158 {offsets = [0, 64], sizes = [4, 32], strides = [1, 1]} : vector<4x96xf32> to vector<4x32xf32>
    %177 = vector.extract_strided_slice %159 {offsets = [0, 64], sizes = [4, 32], strides = [1, 1]} : vector<4x96xf32> to vector<4x32xf32>
    %178 = arith.mulf %167, %177 : vector<4x32xf32>
    %179 = arith.addf %176, %178 : vector<4x32xf32>
    %180 = math.tanh %179 : vector<4x32xf32>
    %cst_55 = arith.constant 1.000000e+00 : f32
    %181 = vector.broadcast %cst_55 : f32 to vector<4x32xf32>
    %182 = arith.subf %181, %175 : vector<4x32xf32>
    %183 = arith.mulf %182, %180 : vector<4x32xf32>
    %184 = arith.mulf %175, %156 : vector<4x32xf32>
    %185 = arith.addf %183, %184 : vector<4x32xf32>
    %c20_56 = arith.constant 20 : index
    %c0_57 = arith.constant 0 : index
    %186 = vector.load %arg11[%c20_56, %c0_57] : memref<32x32xf32, #tpu.memory_space<vmem>>, vector<4x32xf32>
    tpu.vector_store %arg11[%c20_56, %c0_57], %185 {strides = array<i32>} : memref<32x32xf32, #tpu.memory_space<vmem>>, vector<4x32xf32>,
    %c24 = arith.constant 24 : index
    %c0_58 = arith.constant 0 : index
    %187 = vector.load %arg10[%c24, %c0_58] : memref<32x96xf32, #tpu.memory_space<vmem>>, vector<4x96xf32>
    %cst_59 = arith.constant dense<0.000000e+00> : vector<4x96xf32>
    %188 = tpu.matmul %185, %11, %cst_59 {dimension_numbers = #tpu.dot_dimension_numbers<[1], [0], [0], [1], [0, 0, 1, 1], [], []>} : vector<4x32xf32>, vector<32x96xf32>, vector<4x96xf32> -> vector<4x96xf32>
    %189 = vector.extract_strided_slice %187 {offsets = [0, 0], sizes = [4, 32], strides = [1, 1]} : vector<4x96xf32> to vector<4x32xf32>
    %190 = vector.extract_strided_slice %188 {offsets = [0, 0], sizes = [4, 32], strides = [1, 1]} : vector<4x96xf32> to vector<4x32xf32>
    %191 = arith.addf %189, %190 : vector<4x32xf32>
    %192 = arith.negf %191 : vector<4x32xf32>
    %193 = math.exp %192 : vector<4x32xf32>
    %cst_60 = arith.constant 1.000000e+00 : f32
    %194 = vector.broadcast %cst_60 : f32 to vector<4x32xf32>
    %195 = arith.addf %194, %193 : vector<4x32xf32>
    %196 = arith.divf %194, %195 : vector<4x32xf32>
    %197 = vector.extract_strided_slice %187 {offsets = [0, 32], sizes = [4, 32], strides = [1, 1]} : vector<4x96xf32> to vector<4x32xf32>
    %198 = vector.extract_strided_slice %188 {offsets = [0, 32], sizes = [4, 32], strides = [1, 1]} : vector<4x96xf32> to vector<4x32xf32>
    %199 = arith.addf %197, %198 : vector<4x32xf32>
    %200 = arith.negf %199 : vector<4x32xf32>
    %201 = math.exp %200 : vector<4x32xf32>
    %cst_61 = arith.constant 1.000000e+00 : f32
    %202 = vector.broadcast %cst_61 : f32 to vector<4x32xf32>
    %203 = arith.addf %202, %201 : vector<4x32xf32>
    %204 = arith.divf %202, %203 : vector<4x32xf32>
    %205 = vector.extract_strided_slice %187 {offsets = [0, 64], sizes = [4, 32], strides = [1, 1]} : vector<4x96xf32> to vector<4x32xf32>
    %206 = vector.extract_strided_slice %188 {offsets = [0, 64], sizes = [4, 32], strides = [1, 1]} : vector<4x96xf32> to vector<4x32xf32>
    %207 = arith.mulf %196, %206 : vector<4x32xf32>
    %208 = arith.addf %205, %207 : vector<4x32xf32>
    %209 = math.tanh %208 : vector<4x32xf32>
    %cst_62 = arith.constant 1.000000e+00 : f32
    %210 = vector.broadcast %cst_62 : f32 to vector<4x32xf32>
    %211 = arith.subf %210, %204 : vector<4x32xf32>
    %212 = arith.mulf %211, %209 : vector<4x32xf32>
    %213 = arith.mulf %204, %185 : vector<4x32xf32>
    %214 = arith.addf %212, %213 : vector<4x32xf32>
    %c24_63 = arith.constant 24 : index
    %c0_64 = arith.constant 0 : index
    %215 = vector.load %arg11[%c24_63, %c0_64] : memref<32x32xf32, #tpu.memory_space<vmem>>, vector<4x32xf32>
    tpu.vector_store %arg11[%c24_63, %c0_64], %214 {strides = array<i32>} : memref<32x32xf32, #tpu.memory_space<vmem>>, vector<4x32xf32>,
    %c28 = arith.constant 28 : index
    %c0_65 = arith.constant 0 : index
    %216 = vector.load %arg10[%c28, %c0_65] : memref<32x96xf32, #tpu.memory_space<vmem>>, vector<4x96xf32>
    %cst_66 = arith.constant dense<0.000000e+00> : vector<4x96xf32>
    %217 = tpu.matmul %214, %11, %cst_66 {dimension_numbers = #tpu.dot_dimension_numbers<[1], [0], [0], [1], [0, 0, 1, 1], [], []>} : vector<4x32xf32>, vector<32x96xf32>, vector<4x96xf32> -> vector<4x96xf32>
    %218 = vector.extract_strided_slice %216 {offsets = [0, 0], sizes = [4, 32], strides = [1, 1]} : vector<4x96xf32> to vector<4x32xf32>
    %219 = vector.extract_strided_slice %217 {offsets = [0, 0], sizes = [4, 32], strides = [1, 1]} : vector<4x96xf32> to vector<4x32xf32>
    %220 = arith.addf %218, %219 : vector<4x32xf32>
    %221 = arith.negf %220 : vector<4x32xf32>
    %222 = math.exp %221 : vector<4x32xf32>
    %cst_67 = arith.constant 1.000000e+00 : f32
    %223 = vector.broadcast %cst_67 : f32 to vector<4x32xf32>
    %224 = arith.addf %223, %222 : vector<4x32xf32>
    %225 = arith.divf %223, %224 : vector<4x32xf32>
    %226 = vector.extract_strided_slice %216 {offsets = [0, 32], sizes = [4, 32], strides = [1, 1]} : vector<4x96xf32> to vector<4x32xf32>
    %227 = vector.extract_strided_slice %217 {offsets = [0, 32], sizes = [4, 32], strides = [1, 1]} : vector<4x96xf32> to vector<4x32xf32>
    %228 = arith.addf %226, %227 : vector<4x32xf32>
    %229 = arith.negf %228 : vector<4x32xf32>
    %230 = math.exp %229 : vector<4x32xf32>
    %cst_68 = arith.constant 1.000000e+00 : f32
    %231 = vector.broadcast %cst_68 : f32 to vector<4x32xf32>
    %232 = arith.addf %231, %230 : vector<4x32xf32>
    %233 = arith.divf %231, %232 : vector<4x32xf32>
    %234 = vector.extract_strided_slice %216 {offsets = [0, 64], sizes = [4, 32], strides = [1, 1]} : vector<4x96xf32> to vector<4x32xf32>
    %235 = vector.extract_strided_slice %217 {offsets = [0, 64], sizes = [4, 32], strides = [1, 1]} : vector<4x96xf32> to vector<4x32xf32>
    %236 = arith.mulf %225, %235 : vector<4x32xf32>
    %237 = arith.addf %234, %236 : vector<4x32xf32>
    %238 = math.tanh %237 : vector<4x32xf32>
    %cst_69 = arith.constant 1.000000e+00 : f32
    %239 = vector.broadcast %cst_69 : f32 to vector<4x32xf32>
    %240 = arith.subf %239, %233 : vector<4x32xf32>
    %241 = arith.mulf %240, %238 : vector<4x32xf32>
    %242 = arith.mulf %233, %214 : vector<4x32xf32>
    %243 = arith.addf %241, %242 : vector<4x32xf32>
    %c28_70 = arith.constant 28 : index
    %c0_71 = arith.constant 0 : index
    %244 = vector.load %arg11[%c28_70, %c0_71] : memref<32x32xf32, #tpu.memory_space<vmem>>, vector<4x32xf32>
    tpu.vector_store %arg11[%c28_70, %c0_71], %243 {strides = array<i32>} : memref<32x32xf32, #tpu.memory_space<vmem>>, vector<4x32xf32>,
    %c0_72 = arith.constant 0 : index
    %c0_73 = arith.constant 0 : index
    %245 = vector.load %arg11[%c0_72, %c0_73] : memref<32x32xf32, #tpu.memory_space<vmem>>, vector<32x32xf32>
    %c0_74 = arith.constant 0 : index
    %c0_75 = arith.constant 0 : index
    %246 = vector.load %arg7[%c0_74, %c0_75] : memref<32x32xf32, #tpu.memory_space<vmem>>, vector<32x32xf32>
    %cst_76 = arith.constant dense<0.000000e+00> : vector<32x32xf32>
    %247 = tpu.matmul %245, %246, %cst_76 {dimension_numbers = #tpu.dot_dimension_numbers<[1], [0], [0], [1], [0, 0, 1, 1], [], []>} : vector<32x32xf32>, vector<32x32xf32>, vector<32x32xf32> -> vector<32x32xf32>
    %c0_77 = arith.constant 0 : index
    %c0_78 = arith.constant 0 : index
    %248 = vector.load %arg8[%c0_77, %c0_78] : memref<1x32xf32, #tpu.memory_space<vmem>>, vector<1x32xf32>
    %249 = vector.broadcast %248 : vector<1x32xf32> to vector<32x32xf32>
    %250 = arith.addf %247, %249 : vector<32x32xf32>
    %251 = vector.extract_strided_slice %250 {offsets = [0, 0], sizes = [32, 16], strides = [1, 1]} : vector<32x32xf32> to vector<32x16xf32>
    %252 = vector.extract_strided_slice %250 {offsets = [0, 16], sizes = [32, 16], strides = [1, 1]} : vector<32x32xf32> to vector<32x16xf32>
    %c0_79 = arith.constant 0 : index
    %c0_80 = arith.constant 0 : index
    %253 = vector.load %arg2[%c0_79, %c0_80] : memref<32x16xf32, #tpu.memory_space<vmem>>, vector<32x16xf32>
    %cst_81 = arith.constant 5.000000e-01 : f32
    %254 = vector.broadcast %cst_81 : f32 to vector<32x16xf32>
    %255 = arith.mulf %254, %252 : vector<32x16xf32>
    %256 = math.exp %255 : vector<32x16xf32>
    %257 = arith.mulf %253, %256 : vector<32x16xf32>
    %258 = arith.addf %257, %251 : vector<32x16xf32>
    %cst_82 = arith.constant 0.000000e+00 : f32
    %259 = vector.broadcast %cst_82 : f32 to vector<32x48xf32>
    %260 = tpu.concatenate %245, %251, %252, %258, %259 in 1 : vector<32x32xf32>, vector<32x16xf32>, vector<32x16xf32>, vector<32x16xf32>, vector<32x48xf32> -> vector<32x128xf32>
    %c0_83 = arith.constant 0 : index
    %c0_84 = arith.constant 0 : index
    %261 = vector.load %arg9[%c0_83, %c0_84] : memref<32x128xf32, #tpu.memory_space<vmem>>, vector<32x128xf32>
    tpu.vector_store %arg9[%c0_83, %c0_84], %260 {strides = array<i32>} : memref<32x128xf32, #tpu.memory_space<vmem>>, vector<32x128xf32>,
    return
  }
}

</mosaic_0001>

<bundles_post_ra>
// kernel: tpu_custom_call.1
= control target key start
LH: loop header
LB: loop body
LE: loop exit
PB: predicated region body
PF: predicated region fallthrough
CT: control target
= control target key end

     0   :  { %14 = vsyncpa [#allocation5], 0  ;;  %s1367_s0 = inlined_call_operand.vmem [shape: f32[32,5], index: 0, kind: input, shape index: {}]   ;;  %s1368_s1 = inlined_call_operand.hbm [shape: f32[4,32], index: 1, kind: input, shape index: {}]   ;;  %s1369_s2 = inlined_call_operand.vmem [shape: f32[32,16], index: 2, kind: input, shape index: {}]   ;;  %s1370_s3 = inlined_call_operand.vmem [shape: f32[5,25], index: 3, kind: input, shape index: {}]   ;;  %s1371_s4 = inlined_call_operand.vmem [shape: f32[1,25], index: 4, kind: input, shape index: {}]   ;;  %s1372_s5 = inlined_call_operand.vmem [shape: f32[25,96], index: 5, kind: input, shape index: {}]   ;;  %s1373_s6 = inlined_call_operand.vmem [shape: f32[32,96], index: 6, kind: input, shape index: {}]   ;;  %s1374_s7 = inlined_call_operand.hbm [shape: f32[32,32], index: 7, kind: input, shape index: {}]   ;;  %s1375_s8 = inlined_call_operand.vmem [shape: f32[1,32], index: 8, kind: input, shape index: {}]   ;;  %s1376_s9 = inlined_call_operand.hbm [shape: f32[32,128], index: 9, kind: output, shape index: {}]  }
   0x1   :  { %15 = vsyncpa [#allocation8], 0 }
   0x2   :  { %16 = vsyncpa [#allocation6], 0  ;;  %s24_s11 = sshll.u32 %s1368_s1, 4  ;;  %s1070_s12 = smov [#allocation4]   ;;  %s25_s11 = int_to_ptr.hbm [resolvable:$true] %s24_s11 }
   0x3   :  { %s26_s13 = sshll.u32 %s1070_s12, 4  ;;  %s44_s16 = sshll.u32 %s1374_s7, 4  ;;  %s27_s13 = int_to_ptr.vmem [resolvable:$true] %s26_s13  ;;  %s45_s16 = int_to_ptr.hbm [resolvable:$true] %s44_s16 }
   0x4   :  { %29 = dma.hbm_to_vmem [thread:$0]  %s25_s11, 64, %s27_s13, [#allocation5]  }
   0x5   :  { %s1071_s17 = smov [#allocation7]   ;;  %s1072_s19 = smov 128  }
   0x6   :  { %s46_s18 = sshll.u32 %s1071_s17, 4  ;;  %s1073_s20 = smov 8   ;;  %s47_s18 = int_to_ptr.vmem [resolvable:$true] %s46_s18 }
   0x7   :  { %52 = dma.hbm_to_vmem [thread:$0]  %s45_s16, 512, %s47_s18, [#allocation8], %s1072_s19, %s1072_s19, %s1073_s20  }
   0x8   :  { %1064 = dma.done.wait [#allocation5], 64  }
   0x9   :  { %1065 = vsyncadd [#allocation5], 4294967232 }
   0xa   :  { %1066 = dma.done.wait [#allocation8], 512  }
   0xb   :  { %1067 = vsyncadd [#allocation8], 4294966784  ;;  %vm85_vm0 = vcmask 1044480   ;;  %vm72_vm1 = vcmask 39936   ;;  %v67_v0 = vld [vmem:[%s1370_s3] sm:$0x1f] }
   0xc   :  { %v63_v1 = vld [vmem:[%s1367_s0] sm:$0xff]  ;;  %v64_v2 = vld [vmem:[%s1367_s0 + $0x8] sm:$0xff]  ;;  %892 = vmatpush.msk.msra.mxu0 %vm85_vm0, %v67_v0  ;;  %922 = vmatpush.msk.msra.mxu1 %vm85_vm0, %v67_v0  ;;  %v65_v3 = vld [vmem:[%s1367_s0 + $0x10] sm:$0xff]  ;;  %vm139_vm2 = vcmask 1040384   ;;  %vm183_vm3 = vcmask 261120   ;;  %vm126_vm4 = vcmask 203776  }
   0xd   :  { %893 = vmatmul.msk.f32.vlgmr.msra.gmra.mxu0 %vm72_vm1, %v63_v1  ;;  %894 = vmatmul.msk.f32.vlgmr.msra.gmra.mxu1 %vm72_vm1, %v64_v2  ;;  %v1155_v4 = vld [vmem:[%s1373_s6 + $0x18] sm:$0xff]  ;;  %v124_v6 = vld [vmem:[%s1372_s5 + $0x10] sm:$0xff]  ;;  %v1174_v8 = vld [vmem:[%s1373_s6 + $0x8] sm:$0xff]  ;;  %vm172_vm5 = vcmask 785408   ;;  %s1076_s22 = smov 32   ;;  %vm253_vm10 = vcmask 257024  }
   0xe   :  { %923 = vmatpush.msk.msra.mxu2 %vm85_vm0, %v67_v0  ;;  %v125_v5 = vld [vmem:[%s1372_s5 + $0x18] sm:$0x1]  ;;  %924 = vmatpush.msk.msra.mxu3 %vm85_vm0, %v67_v0  ;;  %v1167_v7 = vld [vmem:[%s1373_s6 + $0x10] sm:$0xff]  ;;  %v1181_v9 = vld [vmem:[%s1373_s6] sm:$0xff]  ;;  %s878_s15 = sshll.u32 %s1376_s9, 4  ;;  %s879_s15 = int_to_ptr.hbm [resolvable:$true] %s878_s15 }
   0xf   :  { %895 = vmatmul.msk.f32.vlgmr.msra.gmra.mxu2 %vm72_vm1, %v65_v3  ;;  %897 = vmatpush.msk.msrb.mxu1 %vm139_vm2, %v125_v5  ;;  %v1184_v10 = vld [vmem:[#allocation4] sm:$0xf]  ;;  %v123_v11 = vld [vmem:[%s1372_s5 + $0x8] sm:$0xff]  ;;  %v66_v47 = vld [vmem:[%s1367_s0 + $0x18] sm:$0xff] }
  0x10   :  { %199 = vmatpush.msrb.mxu2 %v1155_v4  ;;  %270 = vmatpush.msrb.mxu3 %v1155_v4  ;;  %v122_v12 = vld [vmem:[%s1372_s5] sm:$0xff]  ;;  %s1075_s5 = smov 96  }
  0x11   :  { %156 = vmatpush.msrb.mxu1 %v124_v6  ;;  %v1208_v13 = vld [vmem:[%s1371_s4] ss:$0 sm:$0xff]  ;;  %s1074_s4 = smov 64   ;;  %896 = vmatmul.msk.f32.vlgmr.msra.gmra.mxu3 %vm72_vm1, %v66_v47 }
  0x12   :  { %200 = vmatpush.msrb.mxu2 %v1167_v7  ;;  %271 = vmatpush.msrb.mxu3 %v1167_v7 }
  0x13   :  { %157 = vmatpush.msrb.mxu1 %v123_v11 }
  0x14   :  { %201 = vmatpush.msrb.mxu2 %v1174_v8  ;;  %272 = vmatpush.msrb.mxu3 %v1174_v8 }
  0x15   :  { %158 = vmatpush.msrb.mxu1 %v122_v12 }
  0x16   :  { %202 = vmatpush.msrb.mxu2 %v1181_v9  ;;  %273 = vmatpush.msrb.mxu3 %v1181_v9 }
  0x17   :  { %902 = vmatmul.msk.f32.vlgmr.msrb.gmra.mxu2 %vm183_vm3, %v1184_v10 }
  0x18   :  { %337 = vmatpush.msra.mxu2 %v1155_v4  ;;  %404 = vmatpush.msra.mxu3 %v1155_v4 }
  0x1a   :  { %338 = vmatpush.msra.mxu2 %v1167_v7  ;;  %405 = vmatpush.msra.mxu3 %v1167_v7 }
  0x1c   :  { %339 = vmatpush.msra.mxu2 %v1174_v8  ;;  %406 = vmatpush.msra.mxu3 %v1174_v8 }
  0x1e   :  { %340 = vmatpush.msra.mxu2 %v1181_v9  ;;  %407 = vmatpush.msra.mxu3 %v1181_v9 }
  0x20   :  { %471 = vmatpush.msrb.mxu2 %v1155_v4 }
  0x22   :  { %472 = vmatpush.msrb.mxu2 %v1167_v7 }
  0x24   :  { %473 = vmatpush.msrb.mxu2 %v1174_v8 }
  0x26   :  { %474 = vmatpush.msrb.mxu2 %v1181_v9 }
  0x8a   :  { %v106_v14 = vpop.f32.mrf.mxu0  ;;  %v109_v16 = vpop.f32.mrf.mxu1 }
  0x8b   :  { %v107_v15 = vadd.f32 %v1208_v13, %v106_v14  ;;  %v110_v18 = vadd.f32 %v1208_v13, %v109_v16 }
  0x8d   :  { %v118_v17 = vmax.f32 %v107_v15, 0.0  ;;  %v119_v20 = vmax.f32 %v110_v18, 0.0 }
  0x8f   :  { %898 = vmatmul.msk.f32.vlgmr.msrb.gmra.mxu1 %vm126_vm4, %v118_v17 }
  0x92   :  { %v112_v19 = vpop.f32.mrf.mxu2 }
  0x93   :  { %v113_v21 = vadd.f32 %v1208_v13, %v112_v19 }
  0x94   :  { %v115_v55 = vpop.f32.mrf.mxu3 }
  0x95   :  { %v120_v23 = vmax.f32 %v113_v21, 0.0  ;;  %v116_v56 = vadd.f32 %v1208_v13, %v115_v55 }
  0x97   :  { %899 = vmatmul.msk.f32.gmra.mxu1 %vm126_vm4, %v119_v20  ;;  %v121_v57 = vmax.f32 %v116_v56, 0.0 }
  0x9a   :  { %v204_v22 = vpop.f32.mrf.mxu2 }
  0x9b   :  { %228 = vrot.lane.b32.xlu0 %v204_v22, %s1074_s4 }
  0x9f   :  { %900 = vmatmul.msk.f32.gmra.mxu1 %vm126_vm4, %v120_v23 }
  0xa7   :  { %901 = vmatmul.msk.f32.gmra.mxu1 %vm126_vm4, %v121_v57 }
 0x10c   :  { %v160_v24 = vpop.f32.mrf.mxu1 }
 0x10d   :  { %173 = vst.msk [vmem:[#allocation2] sm:$0xff] %vm172_vm5, %v160_v24  ;;  %v229_v39 = vpop.permute.xlu0 %228 }
 0x114   :  { %v163_v25 = vpop.f32.mrf.mxu1  ;;  %v182_v26 = vld [vmem:[#allocation2] sm:$0xf]  ;;  %v255_v59 = vld [vmem:[#allocation2 + $0x4] sm:$0xf] }
 0x115   :  { %174 = vst.msk [vmem:[#allocation2 + $0x8] sm:$0xff] %vm172_vm5, %v163_v25  ;;  %v207_v27 = vadd.f32 %v204_v22, %v182_v26  ;;  %v731_v25 = vld [vmem:[#allocation7 + $0x18] sm:$0xff] }
 0x116   :  { %760 = vmatpush.msrb.mxu0 %v731_v25 }
 0x117   :  { %v903_v28 = vmul.f32 -1.442695, %v207_v27  ;;  %v729_v27 = vld [vmem:[#allocation7 + $0x8] sm:$0xff] }
 0x119   :  { %936 = vpow2.f32 %v903_v28  ;;  %v728_v28 = vld [vmem:[#allocation7] sm:$0xff] }
 0x11c   :  { %v166_v29 = vpop.f32.mrf.mxu1 }
 0x11d   :  { %175 = vst.msk [vmem:[#allocation2 + $0x10] sm:$0xff] %vm172_vm5, %v166_v29 }
 0x11f   :  { %v937_v30 = vpop.eup %936 }
 0x120   :  { %v211_v31 = vadd.f32 1.0, %v937_v30 }
 0x122   :  { %938 = vrcp.f32 %v211_v31  ;;  %v223_v35 = vand.u32 2147483648, %v211_v31  ;;  %v221_v37 = vand.u32 2147483647, %v211_v31  ;;  %vm217_vm7 = vweird.f32 %v211_v31 }
 0x124   :  { %v224_v40 = vor.u32 1.1754944e-38, %v223_v35  ;;  %vm222_vm9 = vcmp.eq.f32.partialorder %v221_v37, 8.507059e+37  ;;  %v169_v0 = vpop.f32.mrf.mxu1 }
 0x125   :  { %176 = vst.msk [vmem:[#allocation2 + $0x18] sm:$0xff] %vm172_vm5, %v169_v0 }
 0x128   :  { %v939_v32 = vpop.eup %938 }
 0x129   :  { %v213_v33 = vmul.f32 %v939_v32, %v211_v31  ;;  %vm218_vm6 = vweird.f32 %v939_v32 }
 0x12a   :  { %vm219_vm8 = vmor %vm217_vm7, %vm218_vm6 }
 0x12b   :  { %v214_v34 = vsub.f32 1.0, %v213_v33 }
 0x12d   :  { %v215_v36 = vmul.f32 %v939_v32, %v214_v34 }
 0x12f   :  { %v216_v38 = vadd.f32 %v939_v32, %v215_v36 }
 0x131   :  { %v220_v41 = vsel %vm219_vm8, %v939_v32, %v216_v38  ;;  %v322_v32 = vld [vmem:[#allocation2 + $0x8] sm:$0xf] }
 0x132   :  { %v225_v42 = vsel %vm222_vm9, %v224_v40, %v220_v41 }
 0x133   :  { %v231_v43 = vmul.f32 %v229_v39, %v225_v42  ;;  %v238_v49 = vsub.f32 1.0, %v225_v42 }
 0x135   :  { %233 = vrot.lane.b32.xlu0 %v231_v43, %s1074_s4 }
 0x1a7   :  { %v234_v44 = vpop.permute.xlu0 %233 }
 0x1a8   :  { %v236_v45 = vadd.f32 %v234_v44, %v182_v26  ;;  %v730_v26 = vld [vmem:[#allocation7 + $0x10] sm:$0xff] }
 0x1a9   :  { %761 = vmatpush.msrb.mxu0 %v730_v26 }
 0x1aa   :  { %940 = vtanh.f32 %v236_v45 }
 0x1ab   :  { %762 = vmatpush.msrb.mxu0 %v729_v27 }
 0x1ad   :  { %763 = vmatpush.msrb.mxu0 %v728_v28 }
 0x1b0   :  { %v941_v46 = vpop.eup %940 }
 0x1b1   :  { %240 = vrot.lane.b32.xlu1 %v941_v46, %s1075_s5 }
 0x1b9   :  { %244 = vrot.lane.b32.xlu1 %v1184_v10, %s1076_s22 }
 0x223   :  { %v241_v48 = vpop.permute.xlu1 %240 }
 0x224   :  { %v243_v51 = vmul.f32 %v241_v48, %v238_v49 }
 0x22b   :  { %v245_v50 = vpop.permute.xlu1 %244 }
 0x22c   :  { %v247_v52 = vmul.f32 %v245_v50, %v225_v42 }
 0x22e   :  { %v248_v53 = vadd.f32 %v247_v52, %v243_v51 }
 0x230   :  { %250 = vrot.lane.b32.xlu2 %v248_v53, %s1075_s5 }
 0x28a   :  { %v251_v54 = vpop.permute.xlu2 %250 }
 0x28b   :  { %254 = vst.msk [vmem:[#allocation3] sm:$0xf] %vm253_vm10, %v251_v54  ;;  %904 = vmatmul.msk.f32.vlgmr.msrb.gmra.mxu3 %vm183_vm3, %v251_v54 }
 0x28c   :  { %538 = vmatpush.msrb.mxu3 %v1155_v4 }
 0x28e   :  { %539 = vmatpush.msrb.mxu3 %v1167_v7 }
 0x290   :  { %540 = vmatpush.msrb.mxu3 %v1174_v8 }
 0x292   :  { %541 = vmatpush.msrb.mxu3 %v1181_v9 }
 0x30e   :  { %v275_v58 = vpop.f32.mrf.mxu3 }
 0x30f   :  { %299 = vrot.lane.b32.xlu2 %v275_v58, %s1074_s4  ;;  %v278_v60 = vadd.f32 %v275_v58, %v255_v59 }
 0x311   :  { %v905_v61 = vmul.f32 -1.442695, %v278_v60 }
 0x313   :  { %942 = vpow2.f32 %v905_v61 }
 0x319   :  { %v943_v62 = vpop.eup %942 }
 0x31a   :  { %v282_v63 = vadd.f32 1.0, %v943_v62 }
 0x31c   :  { %944 = vrcp.f32 %v282_v63  ;;  %v294_v10 = vand.u32 2147483648, %v282_v63  ;;  %vm288_vm12 = vweird.f32 %v282_v63  ;;  %v292_v11 = vand.u32 2147483647, %v282_v63 }
 0x31e   :  { %v295_v13 = vor.u32 1.1754944e-38, %v294_v10  ;;  %vm293_vm14 = vcmp.eq.f32.partialorder %v292_v11, 8.507059e+37 }
 0x322   :  { %v945_v1 = vpop.eup %944 }
 0x323   :  { %v284_v2 = vmul.f32 %v945_v1, %v282_v63  ;;  %vm289_vm11 = vweird.f32 %v945_v1 }
 0x324   :  { %vm290_vm13 = vmor %vm288_vm12, %vm289_vm11 }
 0x325   :  { %v285_v3 = vsub.f32 1.0, %v284_v2 }
 0x327   :  { %v286_v5 = vmul.f32 %v945_v1, %v285_v3 }
 0x329   :  { %v287_v6 = vadd.f32 %v945_v1, %v286_v5 }
 0x32b   :  { %v291_v12 = vsel %vm290_vm13, %v945_v1, %v287_v6 }
 0x32c   :  { %v296_v15 = vsel %vm293_vm14, %v295_v13, %v291_v12 }
 0x32d   :  { %v309_v20 = vsub.f32 1.0, %v296_v15  ;;  %v315_v22 = vmul.f32 %v296_v15, %v248_v53 }
 0x369   :  { %v300_v14 = vpop.permute.xlu2 %299 }
 0x36a   :  { %v302_v16 = vmul.f32 %v300_v14, %v296_v15 }
 0x36c   :  { %304 = vrot.lane.b32.xlu0 %v302_v16, %s1074_s4 }
 0x3de   :  { %v305_v17 = vpop.permute.xlu0 %304 }
 0x3df   :  { %v307_v18 = vadd.f32 %v305_v17, %v255_v59  ;;  %v389_v59 = vld [vmem:[#allocation2 + $0xc] sm:$0xf] }
 0x3e1   :  { %946 = vtanh.f32 %v307_v18 }
 0x3e7   :  { %v947_v19 = vpop.eup %946 }
 0x3e8   :  { %311 = vrot.lane.b32.xlu1 %v947_v19, %s1075_s5 }
 0x45a   :  { %v312_v21 = vpop.permute.xlu1 %311 }
 0x45b   :  { %v314_v23 = vmul.f32 %v312_v21, %v309_v20 }
 0x45d   :  { %v316_v24 = vadd.f32 %v315_v22, %v314_v23  ;;  %v456_v23 = vld [vmem:[#allocation2 + $0x10] sm:$0xf] }
 0x45f   :  { %318 = vrot.lane.b32.xlu2 %v316_v24, %s1075_s5 }
 0x4b9   :  { %v319_v29 = vpop.permute.xlu2 %318 }
 0x4ba   :  { %321 = vst.msk [vmem:[#allocation3 + $0x4] sm:$0xf] %vm253_vm10, %v319_v29  ;;  %906 = vmatmul.msk.f32.vlgmr.msra.gmra.mxu2 %vm183_vm3, %v319_v29 }
 0x4bb   :  { %605 = vmatpush.msra.mxu2 %v1155_v4 }
 0x4bd   :  { %606 = vmatpush.msra.mxu2 %v1167_v7 }
 0x4bf   :  { %607 = vmatpush.msra.mxu2 %v1174_v8 }
 0x4c1   :  { %v1251_v30 = vld [vmem:[#allocation3] sm:$0xff]  ;;  %608 = vmatpush.msra.mxu2 %v1181_v9 }
 0x4c2   :  { %918 = vmatmul.msk.f32.vlgmr.msrb.gmra.mxu0 %vm183_vm3, %v1251_v30 }
 0x53d   :  { %v342_v31 = vpop.f32.mrf.mxu2 }
 0x53e   :  { %366 = vrot.lane.b32.xlu0 %v342_v31, %s1074_s4  ;;  %v345_v33 = vadd.f32 %v342_v31, %v322_v32 }
 0x540   :  { %v907_v34 = vmul.f32 -1.442695, %v345_v33 }
 0x542   :  { %948 = vpow2.f32 %v907_v34 }
 0x548   :  { %v949_v35 = vpop.eup %948 }
 0x549   :  { %v349_v36 = vadd.f32 1.0, %v949_v35 }
 0x54b   :  { %950 = vrcp.f32 %v349_v36  ;;  %v361_v42 = vand.u32 2147483648, %v349_v36  ;;  %vm355_vm0 = vweird.f32 %v349_v36  ;;  %v359_v43 = vand.u32 2147483647, %v349_v36 }
 0x54d   :  { %v362_v45 = vor.u32 1.1754944e-38, %v361_v42  ;;  %vm360_vm2 = vcmp.eq.f32.partialorder %v359_v43, 8.507059e+37 }
 0x551   :  { %v951_v37 = vpop.eup %950 }
 0x552   :  { %v351_v38 = vmul.f32 %v951_v37, %v349_v36  ;;  %vm356_vm15 = vweird.f32 %v951_v37 }
 0x553   :  { %vm357_vm1 = vmor %vm355_vm0, %vm356_vm15 }
 0x554   :  { %v352_v39 = vsub.f32 1.0, %v351_v38 }
 0x556   :  { %v353_v40 = vmul.f32 %v951_v37, %v352_v39 }
 0x558   :  { %v354_v41 = vadd.f32 %v951_v37, %v353_v40 }
 0x55a   :  { %v358_v44 = vsel %vm357_vm1, %v951_v37, %v354_v41 }
 0x55b   :  { %v363_v47 = vsel %vm360_vm2, %v362_v45, %v358_v44 }
 0x55c   :  { %v376_v52 = vsub.f32 1.0, %v363_v47  ;;  %v382_v54 = vmul.f32 %v363_v47, %v316_v24 }
 0x5b0   :  { %v367_v46 = vpop.permute.xlu0 %366 }
 0x5b1   :  { %v369_v48 = vmul.f32 %v367_v46, %v363_v47 }
 0x5b3   :  { %371 = vrot.lane.b32.xlu1 %v369_v48, %s1074_s4 }
 0x625   :  { %v372_v49 = vpop.permute.xlu1 %371 }
 0x626   :  { %v374_v50 = vadd.f32 %v372_v49, %v322_v32 }
 0x628   :  { %952 = vtanh.f32 %v374_v50 }
 0x62e   :  { %v953_v51 = vpop.eup %952 }
 0x62f   :  { %378 = vrot.lane.b32.xlu2 %v953_v51, %s1075_s5  ;;  %v523_v51 = vld [vmem:[#allocation2 + $0x14] sm:$0xf] }
 0x689   :  { %v379_v53 = vpop.permute.xlu2 %378 }
 0x68a   :  { %v381_v55 = vmul.f32 %v379_v53, %v376_v52 }
 0x68c   :  { %v383_v56 = vadd.f32 %v382_v54, %v381_v55 }
 0x68e   :  { %385 = vrot.lane.b32.xlu0 %v383_v56, %s1075_s5 }
 0x700   :  { %v386_v57 = vpop.permute.xlu0 %385 }
 0x701   :  { %388 = vst.msk [vmem:[#allocation3 + $0x8] sm:$0xf] %vm253_vm10, %v386_v57  ;;  %908 = vmatmul.msk.f32.vlgmr.msra.gmra.mxu3 %vm183_vm3, %v386_v57 }
 0x702   :  { %672 = vmatpush.msra.mxu3 %v1155_v4 }
 0x704   :  { %673 = vmatpush.msra.mxu3 %v1167_v7 }
 0x706   :  { %674 = vmatpush.msra.mxu3 %v1174_v8 }
 0x708   :  { %675 = vmatpush.msra.mxu3 %v1181_v9 }
 0x784   :  { %v409_v58 = vpop.f32.mrf.mxu3 }
 0x785   :  { %433 = vrot.lane.b32.xlu1 %v409_v58, %s1074_s4  ;;  %v412_v60 = vadd.f32 %v409_v58, %v389_v59 }
 0x787   :  { %v909_v61 = vmul.f32 -1.442695, %v412_v60 }
 0x789   :  { %954 = vpow2.f32 %v909_v61 }
 0x78f   :  { %v955_v62 = vpop.eup %954 }
 0x790   :  { %v416_v63 = vadd.f32 1.0, %v955_v62 }
 0x792   :  { %956 = vrcp.f32 %v416_v63  ;;  %v428_v7 = vand.u32 2147483648, %v416_v63  ;;  %vm422_vm5 = vweird.f32 %v416_v63  ;;  %v426_v8 = vand.u32 2147483647, %v416_v63 }
 0x794   :  { %v429_v5 = vor.u32 1.1754944e-38, %v428_v7  ;;  %vm427_vm7 = vcmp.eq.f32.partialorder %v426_v8, 8.507059e+37 }
 0x798   :  { %v957_v0 = vpop.eup %956 }
 0x799   :  { %v418_v1 = vmul.f32 %v957_v0, %v416_v63  ;;  %vm423_vm4 = vweird.f32 %v957_v0 }
 0x79a   :  { %vm424_vm6 = vmor %vm422_vm5, %vm423_vm4 }
 0x79b   :  { %v419_v2 = vsub.f32 1.0, %v418_v1 }
 0x79d   :  { %v420_v4 = vmul.f32 %v957_v0, %v419_v2 }
 0x79f   :  { %v421_v3 = vadd.f32 %v957_v0, %v420_v4 }
 0x7a1   :  { %v425_v9 = vsel %vm424_vm6, %v957_v0, %v421_v3 }
 0x7a2   :  { %v430_v10 = vsel %vm427_vm7, %v429_v5, %v425_v9 }
 0x7a3   :  { %v443_v15 = vsub.f32 1.0, %v430_v10  ;;  %v449_v17 = vmul.f32 %v430_v10, %v383_v56 }
 0x7f7   :  { %v434_v6 = vpop.permute.xlu1 %433 }
 0x7f8   :  { %v436_v11 = vmul.f32 %v434_v6, %v430_v10 }
 0x7fa   :  { %438 = vrot.lane.b32.xlu2 %v436_v11, %s1074_s4 }
 0x854   :  { %v439_v12 = vpop.permute.xlu2 %438 }
 0x855   :  { %v441_v13 = vadd.f32 %v439_v12, %v389_v59 }
 0x857   :  { %958 = vtanh.f32 %v441_v13 }
 0x85d   :  { %v959_v14 = vpop.eup %958 }
 0x85e   :  { %445 = vrot.lane.b32.xlu0 %v959_v14, %s1075_s5 }
 0x8d0   :  { %v446_v16 = vpop.permute.xlu0 %445 }
 0x8d1   :  { %v448_v18 = vmul.f32 %v446_v16, %v443_v15  ;;  %v590_v15 = vld [vmem:[#allocation2 + $0x18] sm:$0xf] }
 0x8d3   :  { %v450_v19 = vadd.f32 %v449_v17, %v448_v18 }
 0x8d5   :  { %452 = vrot.lane.b32.xlu1 %v450_v19, %s1075_s5 }
 0x947   :  { %v453_v20 = vpop.permute.xlu1 %452 }
 0x948   :  { %455 = vst.msk [vmem:[#allocation3 + $0xc] sm:$0xf] %vm253_vm10, %v453_v20  ;;  %910 = vmatmul.msk.f32.vlgmr.msrb.gmra.mxu2 %vm183_vm3, %v453_v20 }
 0x94f   :  { %v1272_v21 = vld [vmem:[#allocation3 + $0x8] sm:$0xff] }
 0x950   :  { %919 = vmatmul.msk.f32.gmra.mxu0 %vm183_vm3, %v1272_v21 }
 0x9cb   :  { %v476_v22 = vpop.f32.mrf.mxu2 }
 0x9cc   :  { %500 = vrot.lane.b32.xlu2 %v476_v22, %s1074_s4  ;;  %v479_v24 = vadd.f32 %v476_v22, %v456_v23 }
 0x9ce   :  { %v911_v25 = vmul.f32 -1.442695, %v479_v24 }
 0x9d0   :  { %960 = vpow2.f32 %v911_v25 }
 0x9d6   :  { %v961_v26 = vpop.eup %960 }
 0x9d7   :  { %v483_v27 = vadd.f32 1.0, %v961_v26 }
 0x9d9   :  { %962 = vrcp.f32 %v483_v27  ;;  %v495_v34 = vand.u32 2147483648, %v483_v27  ;;  %vm489_vm9 = vweird.f32 %v483_v27  ;;  %v493_v35 = vand.u32 2147483647, %v483_v27 }
 0x9db   :  { %v496_v37 = vor.u32 1.1754944e-38, %v495_v34  ;;  %vm494_vm12 = vcmp.eq.f32.partialorder %v493_v35, 8.507059e+37 }
 0x9df   :  { %v963_v28 = vpop.eup %962 }
 0x9e0   :  { %v485_v29 = vmul.f32 %v963_v28, %v483_v27  ;;  %vm490_vm8 = vweird.f32 %v963_v28 }
 0x9e1   :  { %vm491_vm11 = vmor %vm489_vm9, %vm490_vm8 }
 0x9e2   :  { %v486_v31 = vsub.f32 1.0, %v485_v29 }
 0x9e4   :  { %v487_v32 = vmul.f32 %v963_v28, %v486_v31 }
 0x9e6   :  { %v488_v33 = vadd.f32 %v963_v28, %v487_v32 }
 0x9e8   :  { %v492_v36 = vsel %vm491_vm11, %v963_v28, %v488_v33  ;;  %vm853_vm11 = vcmask 392192  }
 0x9e9   :  { %v497_v39 = vsel %vm494_vm12, %v496_v37, %v492_v36  ;;  %vm858_vm12 = vcmask 523264  }
 0x9ea   :  { %v510_v44 = vsub.f32 1.0, %v497_v39  ;;  %v516_v46 = vmul.f32 %v497_v39, %v450_v19 }
 0xa26   :  { %v501_v38 = vpop.permute.xlu2 %500 }
 0xa27   :  { %v503_v40 = vmul.f32 %v501_v38, %v497_v39 }
 0xa29   :  { %505 = vrot.lane.b32.xlu0 %v503_v40, %s1074_s4 }
 0xa9b   :  { %v506_v41 = vpop.permute.xlu0 %505 }
 0xa9c   :  { %v508_v42 = vadd.f32 %v506_v41, %v456_v23 }
 0xa9e   :  { %964 = vtanh.f32 %v508_v42 }
 0xaa4   :  { %v965_v43 = vpop.eup %964 }
 0xaa5   :  { %512 = vrot.lane.b32.xlu1 %v965_v43, %s1075_s5 }
 0xb17   :  { %v513_v45 = vpop.permute.xlu1 %512 }
 0xb18   :  { %v515_v47 = vmul.f32 %v513_v45, %v510_v44  ;;  %v657_v44 = vld [vmem:[#allocation2 + $0x1c] sm:$0xf] }
 0xb1a   :  { %v517_v48 = vadd.f32 %v516_v46, %v515_v47 }
 0xb1c   :  { %519 = vrot.lane.b32.xlu2 %v517_v48, %s1075_s5 }
 0xb76   :  { %v520_v49 = vpop.permute.xlu2 %519 }
 0xb77   :  { %522 = vst.msk [vmem:[#allocation3 + $0x10] sm:$0xf] %vm253_vm10, %v520_v49  ;;  %912 = vmatmul.msk.f32.vlgmr.msrb.gmra.mxu3 %vm183_vm3, %v520_v49 }
 0xbfa   :  { %v543_v50 = vpop.f32.mrf.mxu3 }
 0xbfb   :  { %567 = vrot.lane.b32.xlu0 %v543_v50, %s1074_s4  ;;  %v546_v52 = vadd.f32 %v543_v50, %v523_v51 }
 0xbfd   :  { %v913_v53 = vmul.f32 -1.442695, %v546_v52  ;;  %v1302_v52 = vld [vmem:[%s1375_s8] ss:$0 sm:$0xff]  ;;  %s1077_s8 = smov 112  }
 0xbff   :  { %966 = vpow2.f32 %v913_v53  ;;  %v765_v53 = vpop.f32.mrf.mxu0 }
 0xc05   :  { %v967_v54 = vpop.eup %966 }
 0xc06   :  { %v550_v55 = vadd.f32 1.0, %v967_v54 }
 0xc08   :  { %968 = vrcp.f32 %v550_v55  ;;  %v562_v61 = vand.u32 2147483648, %v550_v55  ;;  %vm556_vm14 = vweird.f32 %v550_v55  ;;  %v560_v62 = vand.u32 2147483647, %v550_v55 }
 0xc0a   :  { %v563_v0 = vor.u32 1.1754944e-38, %v562_v61  ;;  %vm561_vm0 = vcmp.eq.f32.partialorder %v560_v62, 8.507059e+37 }
 0xc0e   :  { %v969_v56 = vpop.eup %968 }
 0xc0f   :  { %v552_v57 = vmul.f32 %v969_v56, %v550_v55  ;;  %vm557_vm13 = vweird.f32 %v969_v56  ;;  %v766_v55 = vadd.f32 %v1302_v52, %v765_v53 }
 0xc10   :  { %vm558_vm15 = vmor %vm556_vm14, %vm557_vm13  ;;  %vm863_vm13 = vcmask 654336  }
 0xc11   :  { %v553_v58 = vsub.f32 1.0, %v552_v57 }
 0xc13   :  { %v554_v59 = vmul.f32 %v969_v56, %v553_v58 }
 0xc15   :  { %v555_v60 = vadd.f32 %v969_v56, %v554_v59  ;;  %v781_v59 = vmul.f32 0.5, %v766_v55 }
 0xc17   :  { %v559_v63 = vsel %vm558_vm15, %v969_v56, %v555_v60  ;;  %v785_v62 = vmul.f32 1.442695, %v781_v59 }
 0xc18   :  { %v564_v2 = vsel %vm561_vm0, %v563_v0, %v559_v63 }
 0xc19   :  { %v577_v9 = vsub.f32 1.0, %v564_v2  ;;  %v583_v6 = vmul.f32 %v564_v2, %v517_v48 }
 0xc6d   :  { %v568_v1 = vpop.permute.xlu0 %567 }
 0xc6e   :  { %v570_v4 = vmul.f32 %v568_v1, %v564_v2 }
 0xc70   :  { %572 = vrot.lane.b32.xlu1 %v570_v4, %s1074_s4  ;;  %v768_v4 = vpop.f32.mrf.mxu0 }
 0xce2   :  { %v573_v3 = vpop.permute.xlu1 %572 }
 0xce3   :  { %v575_v7 = vadd.f32 %v573_v3, %v523_v51  ;;  %v1308_v3 = vadd.f32 %v1302_v52, %v768_v4 }
 0xce5   :  { %970 = vtanh.f32 %v575_v7 }
 0xceb   :  { %v971_v8 = vpop.eup %970 }
 0xcec   :  { %579 = vrot.lane.b32.xlu2 %v971_v8, %s1075_s5 }
 0xd46   :  { %v580_v5 = vpop.permute.xlu2 %579 }
 0xd47   :  { %v582_v10 = vmul.f32 %v580_v5, %v577_v9  ;;  %v782_v9 = vmul.f32 0.5, %v1308_v3 }
 0xd49   :  { %v584_v11 = vadd.f32 %v583_v6, %v582_v10  ;;  %v787_v5 = vmul.f32 1.442695, %v782_v9 }
 0xd4b   :  { %586 = vrot.lane.b32.xlu0 %v584_v11, %s1075_s5 }
 0xdbd   :  { %v587_v12 = vpop.permute.xlu0 %586 }
 0xdbe   :  { %589 = vst.msk [vmem:[#allocation3 + $0x14] sm:$0xf] %vm253_vm10, %v587_v12  ;;  %914 = vmatmul.msk.f32.vlgmr.msra.gmra.mxu2 %vm183_vm3, %v587_v12 }
 0xdc5   :  { %v1288_v13 = vld [vmem:[#allocation3 + $0x10] sm:$0xff] }
 0xdc6   :  { %920 = vmatmul.msk.f32.gmra.mxu0 %vm183_vm3, %v1288_v13 }
 0xe41   :  { %v610_v14 = vpop.f32.mrf.mxu2 }
 0xe42   :  { %634 = vrot.lane.b32.xlu1 %v610_v14, %s1074_s4  ;;  %v613_v16 = vadd.f32 %v610_v14, %v590_v15 }
 0xe44   :  { %v915_v17 = vmul.f32 -1.442695, %v613_v16 }
 0xe46   :  { %972 = vpow2.f32 %v915_v17 }
 0xe4c   :  { %v973_v18 = vpop.eup %972 }
 0xe4d   :  { %v617_v19 = vadd.f32 1.0, %v973_v18 }
 0xe4f   :  { %974 = vrcp.f32 %v617_v19  ;;  %v629_v26 = vand.u32 2147483648, %v617_v19  ;;  %vm623_vm2 = vweird.f32 %v617_v19  ;;  %v627_v27 = vand.u32 2147483647, %v617_v19 }
 0xe51   :  { %v630_v29 = vor.u32 1.1754944e-38, %v629_v26  ;;  %vm628_vm5 = vcmp.eq.f32.partialorder %v627_v27, 8.507059e+37 }
 0xe55   :  { %v975_v20 = vpop.eup %974 }
 0xe56   :  { %v619_v22 = vmul.f32 %v975_v20, %v617_v19  ;;  %vm624_vm1 = vweird.f32 %v975_v20 }
 0xe57   :  { %vm625_vm4 = vmor %vm623_vm2, %vm624_vm1 }
 0xe58   :  { %v620_v23 = vsub.f32 1.0, %v619_v22 }
 0xe5a   :  { %v621_v24 = vmul.f32 %v975_v20, %v620_v23  ;;  %v777_v23 = vld [vmem:[%s1369_s2] sm:$0xff] }
 0xe5c   :  { %v622_v25 = vadd.f32 %v975_v20, %v621_v24 }
 0xe5e   :  { %v626_v28 = vsel %vm625_vm4, %v975_v20, %v622_v25 }
 0xe5f   :  { %v631_v32 = vsel %vm628_vm5, %v630_v29, %v626_v28 }
 0xe60   :  { %v644_v37 = vsub.f32 1.0, %v631_v32  ;;  %v650_v39 = vmul.f32 %v631_v32, %v584_v11  ;;  %v771_v11 = vpop.f32.mrf.mxu0 }
 0xe61   :  { %v772_v12 = vadd.f32 %v1302_v52, %v771_v11 }
 0xe63   :  { %v783_v14 = vmul.f32 0.5, %v772_v12 }
 0xe65   :  { %v789_v19 = vmul.f32 1.442695, %v783_v14 }
 0xeb4   :  { %v635_v31 = vpop.permute.xlu1 %634 }
 0xeb5   :  { %v637_v33 = vmul.f32 %v635_v31, %v631_v32 }
 0xeb7   :  { %639 = vrot.lane.b32.xlu2 %v637_v33, %s1074_s4 }
 0xf11   :  { %v640_v34 = vpop.permute.xlu2 %639 }
 0xf12   :  { %v642_v35 = vadd.f32 %v640_v34, %v590_v15 }
 0xf14   :  { %976 = vtanh.f32 %v642_v35 }
 0xf1a   :  { %v977_v36 = vpop.eup %976 }
 0xf1b   :  { %646 = vrot.lane.b32.xlu0 %v977_v36, %s1075_s5 }
 0xf8d   :  { %v647_v38 = vpop.permute.xlu0 %646 }
 0xf8e   :  { %v649_v40 = vmul.f32 %v647_v38, %v644_v37 }
 0xf90   :  { %v651_v41 = vadd.f32 %v650_v39, %v649_v40 }
 0xf92   :  { %653 = vrot.lane.b32.xlu1 %v651_v41, %s1075_s5 }
0x1004   :  { %v654_v42 = vpop.permute.xlu1 %653 }
0x1005   :  { %656 = vst.msk [vmem:[#allocation3 + $0x18] sm:$0xf] %vm253_vm10, %v654_v42  ;;  %916 = vmatmul.msk.f32.vlgmr.msra.gmra.mxu3 %vm183_vm3, %v654_v42 }
0x1088   :  { %v677_v43 = vpop.f32.mrf.mxu3 }
0x1089   :  { %701 = vrot.lane.b32.xlu2 %v677_v43, %s1074_s4  ;;  %v680_v45 = vadd.f32 %v677_v43, %v657_v44 }
0x108b   :  { %v917_v46 = vmul.f32 -1.442695, %v680_v45 }
0x108d   :  { %978 = vpow2.f32 %v917_v46  ;;  %v778_v46 = vld [vmem:[%s1369_s2 + $0x8] sm:$0xff] }
0x1093   :  { %v979_v47 = vpop.eup %978 }
0x1094   :  { %v684_v48 = vadd.f32 1.0, %v979_v47 }
0x1096   :  { %980 = vrcp.f32 %v684_v48  ;;  %v696_v57 = vand.u32 2147483648, %v684_v48  ;;  %vm690_vm7 = vweird.f32 %v684_v48  ;;  %v694_v58 = vand.u32 2147483647, %v684_v48 }
0x1097   :  { %982 = vpow2.f32 %v785_v62 }
0x1098   :  { %v697_v61 = vor.u32 1.1754944e-38, %v696_v57  ;;  %vm695_vm9 = vcmp.eq.f32.partialorder %v694_v58, 8.507059e+37 }
0x109c   :  { %v981_v49 = vpop.eup %980 }
0x109d   :  { %v686_v50 = vmul.f32 %v981_v49, %v684_v48  ;;  %vm691_vm6 = vweird.f32 %v981_v49  ;;  %v983_v2 = vpop.eup %982 }
0x109e   :  { %vm692_vm8 = vmor %vm690_vm7, %vm691_vm6 }
0x109f   :  { %v687_v51 = vsub.f32 1.0, %v686_v50 }
0x10a1   :  { %v688_v54 = vmul.f32 %v981_v49, %v687_v51 }
0x10a3   :  { %v689_v56 = vadd.f32 %v981_v49, %v688_v54 }
0x10a5   :  { %v693_v60 = vsel %vm692_vm8, %v981_v49, %v689_v56  ;;  %v780_v49 = vld [vmem:[%s1369_s2 + $0x18] sm:$0xff] }
0x10a6   :  { %v698_v0 = vsel %vm695_vm9, %v697_v61, %v693_v60 }
0x10a7   :  { %v711_v15 = vsub.f32 1.0, %v698_v0  ;;  %v717_v17 = vmul.f32 %v698_v0, %v651_v41  ;;  %v779_v41 = vld [vmem:[%s1369_s2 + $0x10] sm:$0xff]  ;;  %s1078_s2 = smov [#allocation9]  }
0x10a8   :  { %s876_s12 = sshll.u32 %s1078_s2, 4  ;;  %s877_s12 = int_to_ptr.vmem [resolvable:$true] %s876_s12 }
0x10e3   :  { %v702_v63 = vpop.permute.xlu2 %701 }
0x10e4   :  { %v704_v1 = vmul.f32 %v702_v63, %v698_v0 }
0x10e6   :  { %706 = vrot.lane.b32.xlu0 %v704_v1, %s1074_s4 }
0x10ee   :  { %797 = vrot.lane.b32.xlu0 %v983_v2, %s1077_s8 }
0x1158   :  { %v707_v7 = vpop.permute.xlu0 %706 }
0x1159   :  { %v709_v8 = vadd.f32 %v707_v7, %v657_v44 }
0x115b   :  { %984 = vtanh.f32 %v709_v8 }
0x115c   :  { %986 = vpow2.f32 %v787_v5 }
0x115d   :  { %988 = vpow2.f32 %v789_v19 }
0x1160   :  { %v798_v24 = vpop.permute.xlu0 %797 }
0x1161   :  { %v985_v6 = vpop.eup %984  ;;  %v809_v25 = vmul.f32 %v798_v24, %v777_v23 }
0x1162   :  { %713 = vrot.lane.b32.xlu1 %v985_v6, %s1075_s5  ;;  %v987_v10 = vpop.eup %986 }
0x1163   :  { %v989_v22 = vpop.eup %988  ;;  %v813_v26 = vadd.f32 %v809_v25, %v766_v55 }
0x116a   :  { %799 = vrot.lane.b32.xlu1 %v987_v10, %s1077_s8 }
0x1172   :  { %821 = vrot.lane.b32.xlu1 %v766_v55, %s1076_s22 }
0x11d4   :  { %v714_v16 = vpop.permute.xlu1 %713 }
0x11d5   :  { %v716_v18 = vmul.f32 %v714_v16, %v711_v15 }
0x11d7   :  { %v718_v20 = vadd.f32 %v717_v17, %v716_v18 }
0x11d9   :  { %720 = vrot.lane.b32.xlu2 %v718_v20, %s1075_s5 }
0x11dc   :  { %v800_v28 = vpop.permute.xlu1 %799 }
0x11dd   :  { %v810_v47 = vmul.f32 %v800_v28, %v778_v46 }
0x11df   :  { %v814_v48 = vadd.f32 %v810_v47, %v1308_v3 }
0x11e1   :  { %801 = vrot.lane.b32.xlu2 %v989_v22, %s1077_s8 }
0x11e4   :  { %v822_v33 = vpop.permute.xlu1 %821 }
0x11e5   :  { %v849_v34 = vsel %vm183_vm3, %v1251_v30, %v822_v33 }
0x11e6   :  { %v854_v35 = vsel %vm853_vm11, %v849_v34, %v822_v33 }
0x11e9   :  { %823 = vrot.lane.b32.xlu2 %v1308_v3, %s1076_s22 }
0x11f1   :  { %837 = vrot.lane.b32.xlu2 %v813_v26, %s1074_s4 }
0x1233   :  { %v721_v27 = vpop.permute.xlu2 %720 }
0x1234   :  { %723 = vst.msk [vmem:[#allocation3 + $0x1c] sm:$0xf] %vm253_vm10, %v721_v27 }
0x123b   :  { %v802_v29 = vpop.permute.xlu2 %801  ;;  %v727_v31 = vld [vmem:[#allocation3 + $0x18] sm:$0xff] }
0x123c   :  { %921 = vmatmul.msk.f32.gmra.mxu0 %vm183_vm3, %v727_v31  ;;  %v811_v30 = vmul.f32 %v802_v29, %v779_v41 }
0x123e   :  { %v815_v44 = vadd.f32 %v811_v30, %v772_v12 }
0x1243   :  { %v824_v32 = vpop.permute.xlu2 %823 }
0x1244   :  { %v850_v60 = vsel %vm183_vm3, %v1272_v21, %v824_v32 }
0x1245   :  { %v855_v61 = vsel %vm853_vm11, %v850_v60, %v824_v32 }
0x124b   :  { %v838_v36 = vpop.permute.xlu2 %837 }
0x124c   :  { %v859_v37 = vsel %vm858_vm12, %v854_v35, %v838_v36 }
0x124d   :  { %v864_v38 = vsel %vm863_vm13, %v859_v37, 0.0 }
0x124e   :  { %868 = vst [vmem:[#allocation9] sm:$0xff] %v864_v38 }
0x12b9   :  { %v774_v39 = vpop.f32.mrf.mxu0 }
0x12ba   :  { %v775_v40 = vadd.f32 %v1302_v52, %v774_v39 }
0x12bc   :  { %v784_v42 = vmul.f32 0.5, %v775_v40  ;;  %827 = vrot.lane.b32.xlu1 %v775_v40, %s1076_s22 }
0x12be   :  { %v791_v43 = vmul.f32 1.442695, %v784_v42 }
0x12c0   :  { %990 = vpow2.f32 %v791_v43 }
0x12c4   :  { %841 = vrot.lane.b32.xlu1 %v815_v44, %s1074_s4 }
0x12c6   :  { %v991_v45 = vpop.eup %990 }
0x12c7   :  { %803 = vrot.lane.b32.xlu0 %v991_v45, %s1077_s8 }
0x12cf   :  { %825 = vrot.lane.b32.xlu0 %v772_v12, %s1076_s22 }
0x12d7   :  { %839 = vrot.lane.b32.xlu0 %v814_v48, %s1074_s4 }
0x132e   :  { %v828_v50 = vpop.permute.xlu1 %827 }
0x1336   :  { %v842_v56 = vpop.permute.xlu1 %841 }
0x1339   :  { %v804_v51 = vpop.permute.xlu0 %803 }
0x133a   :  { %v812_v52 = vmul.f32 %v804_v51, %v780_v49 }
0x133c   :  { %v816_v53 = vadd.f32 %v812_v52, %v775_v40 }
0x133e   :  { %843 = vrot.lane.b32.xlu2 %v816_v53, %s1074_s4 }
0x1341   :  { %v826_v54 = vpop.permute.xlu0 %825 }
0x1342   :  { %v851_v55 = vsel %vm183_vm3, %v1288_v13, %v826_v54  ;;  %v852_v13 = vsel %vm183_vm3, %v727_v31, %v828_v50 }
0x1343   :  { %v856_v57 = vsel %vm853_vm11, %v851_v55, %v826_v54  ;;  %v857_v1 = vsel %vm853_vm11, %v852_v13, %v828_v50 }
0x1344   :  { %v861_v58 = vsel %vm858_vm12, %v856_v57, %v842_v56 }
0x1345   :  { %v866_v59 = vsel %vm863_vm13, %v861_v58, 0.0 }
0x1346   :  { %870 = vst [vmem:[#allocation9 + $0x10] sm:$0xff] %v866_v59 }
0x1349   :  { %v840_v62 = vpop.permute.xlu0 %839 }
0x134a   :  { %v860_v63 = vsel %vm858_vm12, %v855_v61, %v840_v62 }
0x134b   :  { %v865_v0 = vsel %vm863_vm13, %v860_v63, 0.0 }
0x134c   :  { %869 = vst [vmem:[#allocation9 + $0x8] sm:$0xff] %v865_v0 }
0x1398   :  { %v844_v21 = vpop.permute.xlu2 %843 }
0x1399   :  { %v862_v2 = vsel %vm858_vm12, %v857_v1, %v844_v21 }
0x139a   :  { %v867_v4 = vsel %vm863_vm13, %v862_v2, 0.0 }
0x139b   :  { %871 = vst [vmem:[#allocation9 + $0x18] sm:$0xff] %v867_v4 }
0x139c   :  { %884 = dma.vmem_to_hbm [thread:$0]  %s877_s12, 512, %s879_s15, [#allocation6], %s1072_s19, %s1072_s19, %s1073_s20  }
0x139d   :  { %1068 = dma.done.wait [#allocation6], 512  }
0x139e   :  { %1069 = vsyncadd [#allocation6], 4294966784 }
0x139f   :  { %889 = vsyncpa [#allocation5], 1 }
0x13a0   :  { %890 = vsyncpa [#allocation8], 1 }
0x13a1   :  { %891 = vsyncpa [#allocation6], 1 }

</bundles_post_ra>
